<compile_context>
chip_gen: v6e
topology: v6e:2x2x1
jax: 0.10.0
libtpu: 0.0.40
codegen_flags: <defaults>
</compile_context>

<pallas_src>
import functools
import math

import jax
import jax.numpy as jnp
from jax import lax
from jax.experimental import pallas as pl
from jax.experimental.pallas import tpu as pltpu


def _mod(a, m: int):
    """Trace-time specialized modulo: bitwise-and for power-of-two m."""
    if m >= 1 and (m & (m - 1)) == 0:
        return a & (m - 1)
    return a % m


def _spatial_exchange_kernel(x1_ref, x2_ref, o1_ref, o2_ref, *,
                             w: int, p: int, row_aware: bool):
    x1 = x1_ref[...]
    x2 = x2_ref[...]
    rows, lanes = x1.shape
    lane_idx = lax.broadcasted_iota(jnp.int32, (1, lanes), dimension=1)
    if row_aware:
        # W-index of each element from its global flat offset.  Every term is
        # reduced mod w so nothing overflows int32 regardless of tensor size.
        blk_elems_mod_w = (rows * lanes) % w
        blk_off = _mod(_mod(pl.program_id(0), w) * blk_elems_mod_w, w)
        row_idx = lax.broadcasted_iota(jnp.int32, (rows, 1), dimension=0)
        elem_off = row_idx * lanes + lane_idx          # < rows*lanes per tile
        w_idx = _mod(blk_off + _mod(elem_off, w), w)
    else:
        # Blocks start at lane 0 and lanes % w == 0 -> (lane % w) is the
        # original W index; mask is row-independent.
        w_idx = _mod(lane_idx, w)
    exch = _mod(w_idx, p) == 0
    # VPU elementwise selects; full-lane stores.
    o1_ref[...] = jnp.where(exch, x2, x1)
    o2_ref[...] = jnp.where(exch, x1, x2)


def _sublane_align(dtype) -> int:
    # f32 -> 8, bf16/f16 -> 16, int8/fp8 -> 32 (sub-32-bit dtypes pack sublanes).
    return max(8, 32 // jnp.dtype(dtype).itemsize)


def _round_up(x: int, m: int) -> int:
    return -(-x // m) * m


def _vmem_limit_bytes(tile_bytes: int) -> int:
    # 2 inputs + 2 outputs, double-buffered -> 8 live tile buffers (+ margin).
    need = 8 * tile_bytes + (4 << 20)
    try:  # generation-aware cap; leave headroom for Mosaic internal scratch
        cap = int(pltpu.get_tpu_info().vmem_capacity_bytes) - (16 << 20)
    except Exception:
        cap = 48 << 20  # safe even on v7x (64 MiB per TensorCore)
    cap = max(cap, 32 << 20)
    return int(min(max(need, 32 << 20), cap))


def changer_spatial_exchange(x1, x2, p: int = 2, *, max_tile_bytes: int = 4 << 20):
    assert x1.shape == x2.shape and x1.dtype == x2.dtype
    N, C, H, W = x1.shape
    total = N * C * H * W
    itemsize = jnp.dtype(x1.dtype).itemsize
    align = _sublane_align(x1.dtype)

    # Lane extent L: multiple of 128, capped so even an `align`-row tile stays
    # within the per-operand tile budget (and by 8192 to keep the grid useful).
    lane_cap = max(128, min(8192, (max_tile_bytes // (itemsize * align)) // 128 * 128))

    base = math.lcm(W, 128)
    if base <= lane_cap and total % base == 0:
        # No padding needed; mask is a static per-lane pattern.
        L = base
        while L * 2 <= lane_cap and total % (L * 2) == 0:
            L *= 2
        rows = total // L
        pad = 0
        row_aware = False
    else:
        # Pad the flat stream to a lane-dense (rows, L) slab; the mask becomes
        # row/program-id aware.  Padded tail is sliced off wrapper-side.
        L = min(lane_cap, _round_up(total, 128))
        rows = -(-total // L)
        pad = rows * L - total
        row_aware = True

    x1f = x1.reshape(-1)
    x2f = x2.reshape(-1)
    if pad:
        x1f = jnp.pad(x1f, (0, pad))
        x2f = jnp.pad(x2f, (0, pad))
    x1f = x1f.reshape(rows, L)
    x2f = x2f.reshape(rows, L)

    # Row tile: ~max_tile_bytes per operand, dtype-aware sublane alignment;
    # full extent (always legal) when the whole slab fits in one tile.
    tile_r = max(align, (max_tile_bytes // (L * itemsize)) // align * align)
    if tile_r >= rows:
        tile_r = rows
    grid = (pl.cdiv(rows, tile_r),)

    spec = pl.BlockSpec((tile_r, L), lambda i: (i, 0))
    out_shape = jax.ShapeDtypeStruct((rows, L), x1.dtype)
    kernel = functools.partial(_spatial_exchange_kernel, w=W, p=p, row_aware=row_aware)

    tile_bytes = tile_r * L * itemsize
    bytes_accessed = 4 * rows * L * itemsize  # 2 streamed in + 2 streamed out

    # NOTE: input_output_aliases={0: 0, 1: 1} would be safe (identical block
    # index maps) but only pays off with donated inputs at the call site.
    o1f, o2f = pl.pallas_call(
        kernel,
        grid=grid,
        in_specs=[spec, spec],
        out_specs=(spec, spec),
        out_shape=(out_shape, out_shape),
        compiler_params=pltpu.CompilerParams(
            dimension_semantics=("parallel",),
            vmem_limit_bytes=_vmem_limit_bytes(tile_bytes),
        ),
        cost_estimate=pl.CostEstimate(
            flops=0, transcendentals=0, bytes_accessed=bytes_accessed),
    )(x1f, x2f)

    if pad:
        o1 = o1f.reshape(-1)[:total].reshape(N, C, H, W)
        o2 = o2f.reshape(-1)[:total].reshape(N, C, H, W)
    else:
        o1 = o1f.reshape(N, C, H, W)
        o2 = o2f.reshape(N, C, H, W)
    return o1, o2


def _reference(x1, x2, p=2):
    w = x1.shape[-1]
    mask = (jnp.arange(w) % p) == 0
    out1 = jnp.where(mask, x2, x1)
    out2 = jnp.where(mask, x1, x2)
    return out1, out2


if __name__ == "__main__":
    key = jax.random.PRNGKey(0)
    k1, k2, k3, k4, k5, k6 = jax.random.split(key, 6)

    # 1) Module-typical shape, p=2, f32 (lane-dense no-pad path).
    N, C, H, W = 2, 4, 16, 16
    x1 = jax.random.normal(k1, (N, C, H, W), dtype=jnp.float32)
    x2 = jax.random.normal(k2, (N, C, H, W), dtype=jnp.float32)
    o1, o2 = changer_spatial_exchange(x1, x2, p=2)
    jax.block_until_ready((o1, o2))
    r1, r2 = _reference(x1, x2, p=2)
    assert jnp.allclose(o1, r1) and jnp.allclose(o2, r2)

    # 2) Larger W, p=3 (lane-dense streaming path).
    y1 = jax.random.normal(k3, (2, 8, 32, 64), dtype=jnp.float32)
    y2 = jax.random.normal(k4, (2, 8, 32, 64), dtype=jnp.float32)
    q1, q2 = changer_spatial_exchange(y1, y2, p=3)
    jax.block_until_ready((q1, q2))
    s1, s2 = _reference(y1, y2, p=3)
    assert jnp.allclose(q1, s1) and jnp.allclose(q2, s2)

    # 3) W=7 (does not tile into 128 lanes): padded, row/program-id-aware mask,
    #    with a tiny tile budget to force a multi-block ragged cdiv grid.
    z1 = jax.random.normal(k5, (2, 8, 83, 7), dtype=jnp.float32)
    z2 = jax.random.normal(k6, (2, 8, 83, 7), dtype=jnp.float32)
    t1, t2 = changer_spatial_exchange(z1, z2, p=2, max_tile_bytes=16 << 10)
    jax.block_until_ready((t1, t2))
    u1, u2 = _reference(z1, z2, p=2)
    assert jnp.allclose(t1, u1) and jnp.allclose(t2, u2)

    # 4) bf16 (dtype-aware sublane alignment path); exchange is exact.
    b1 = x1.astype(jnp.bfloat16)
    b2 = x2.astype(jnp.bfloat16)
    c1, c2 = changer_spatial_exchange(b1, b2, p=2)
    jax.block_until_ready((c1, c2))
    d1, d2 = _reference(b1, b2, p=2)
    assert jnp.allclose(c1, d1) and jnp.allclose(c2, d2)

    print("KERNEL_OK")
</pallas_src>

<mosaic_0001>
module attributes {stable_mosaic.version = 11 : i64} {
  func.func @_spatial_exchange_kernel(%arg0: i32, %arg1: memref<1x2048xf32, #tpu.memory_space<vmem>>, %arg2: memref<1x2048xf32, #tpu.memory_space<vmem>>, %arg3: memref<1x2048xf32, #tpu.memory_space<vmem>>, %arg4: memref<1x2048xf32, #tpu.memory_space<vmem>>) attributes {dimension_semantics = [#tpu.dimension_semantics<parallel>], iteration_bounds = array<i64: 1>, scalar_prefetch = 0 : i64, scratch_operands = 0 : i64, tpu.core_type = #tpu.core_type<tc>, window_params = [{transform_indices = @transform_0, window_bounds = array<i64: 1, 2048>}, {transform_indices = @transform_1, window_bounds = array<i64: 1, 2048>}, {transform_indices = @transform_2, window_bounds = array<i64: 1, 2048>}, {transform_indices = @transform_3, window_bounds = array<i64: 1, 2048>}]} {
    %c0 = arith.constant 0 : index
    %c0_0 = arith.constant 0 : index
    %0 = vector.load %arg1[%c0, %c0_0] : memref<1x2048xf32, #tpu.memory_space<vmem>>, vector<1x2048xf32>
    %c0_1 = arith.constant 0 : index
    %c0_2 = arith.constant 0 : index
    %1 = vector.load %arg2[%c0_1, %c0_2] : memref<1x2048xf32, #tpu.memory_space<vmem>>, vector<1x2048xf32>
    %2 = tpu.iota {dimensions = array<i32: 1>} : vector<1x2048xi32>
    %c15_i32 = arith.constant 15 : i32
    %3 = vector.broadcast %c15_i32 : i32 to vector<1x2048xi32>
    %4 = arith.andi %2, %3 : vector<1x2048xi32>
    %c1_i32 = arith.constant 1 : i32
    %5 = vector.broadcast %c1_i32 : i32 to vector<1x2048xi32>
    %6 = arith.andi %4, %5 : vector<1x2048xi32>
    %c0_i32 = arith.constant 0 : i32
    %7 = vector.broadcast %c0_i32 : i32 to vector<1x2048xi32>
    %8 = arith.cmpi eq, %6, %7 : vector<1x2048xi32>
    %9 = arith.select %8, %1, %0 : vector<1x2048xi1>, vector<1x2048xf32>
    %c0_3 = arith.constant 0 : index
    %c0_4 = arith.constant 0 : index
    %10 = vector.load %arg3[%c0_3, %c0_4] : memref<1x2048xf32, #tpu.memory_space<vmem>>, vector<1x2048xf32>
    tpu.vector_store %arg3[%c0_3, %c0_4], %9 {strides = array<i32>} : memref<1x2048xf32, #tpu.memory_space<vmem>>, vector<1x2048xf32>,
    %11 = arith.select %8, %0, %1 : vector<1x2048xi1>, vector<1x2048xf32>
    %c0_5 = arith.constant 0 : index
    %c0_6 = arith.constant 0 : index
    %12 = vector.load %arg4[%c0_5, %c0_6] : memref<1x2048xf32, #tpu.memory_space<vmem>>, vector<1x2048xf32>
    tpu.vector_store %arg4[%c0_5, %c0_6], %11 {strides = array<i32>} : memref<1x2048xf32, #tpu.memory_space<vmem>>, vector<1x2048xf32>,
    return
  }
  func.func @transform_0(%arg0: i32) -> (i32, i32) {
    %c0_i32 = arith.constant 0 : i32
    %c0_i32_0 = arith.constant 0 : i32
    return %arg0, %c0_i32 : i32, i32
  }
  func.func @transform_1(%arg0: i32) -> (i32, i32) {
    %c0_i32 = arith.constant 0 : i32
    %c0_i32_0 = arith.constant 0 : i32
    return %arg0, %c0_i32 : i32, i32
  }
  func.func @transform_2(%arg0: i32) -> (i32, i32) {
    %c0_i32 = arith.constant 0 : i32
    %c0_i32_0 = arith.constant 0 : i32
    return %arg0, %c0_i32 : i32, i32
  }
  func.func @transform_3(%arg0: i32) -> (i32, i32) {
    %c0_i32 = arith.constant 0 : i32
    %c0_i32_0 = arith.constant 0 : i32
    return %arg0, %c0_i32 : i32, i32
  }
}

</mosaic_0001>

<bundles_post_ra>
// kernel: tpu_custom_call.1
= control target key start
LH: loop header
LB: loop body
LE: loop exit
PB: predicated region body
PF: predicated region fallthrough
CT: control target
= control target key end

     0   :  { %9 = vsyncpa [#allocation3], 0  ;;  %s984_s0 = inlined_call_operand.hbm [shape: f32[1,2048], index: 0, kind: input, shape index: {}]   ;;  %s985_s1 = inlined_call_operand.hbm [shape: f32[1,2048], index: 1, kind: input, shape index: {}]   ;;  %s986_s2 = inlined_call_operand.hbm [shape: f32[1,2048], index: 2, kind: output, shape index: {0}]   ;;  %s987_s3 = inlined_call_operand.hbm [shape: f32[1,2048], index: 3, kind: output, shape index: {1}]  }
   0x1   :  { %10 = vsyncpa [#allocation6], 0 }
   0x2   :  { %11 = vsyncpa [#allocation4], 0 }
   0x3   :  { %12 = vsyncpa [#allocation9], 0  ;;  %s663_s12 = smov [#allocation2]   ;;  %s664_s14 = smov [#allocation5]  }
   0x4   :  { %s19_s13 = sshll.u32 %s663_s12, 4  ;;  %s29_s15 = sshll.u32 %s664_s14, 4  ;;  %s20_s13 = int_to_ptr.vmem [resolvable:$true] %s19_s13  ;;  %s30_s15 = int_to_ptr.vmem [resolvable:$true] %s29_s15 }
   0x5   :  { %s583_s16 = scalar_lea.vmem %s20_s13, 256  ;;  %p588_p1 = scmp.lt.s32.totalorder %s20_s13, %s20_s13 }
   0x6   :  { %p584_p0 = scmp.ne.s32.totalorder %s20_s13, %s583_s16  ;;  %p589_p2 = scmp.lt.s32.totalorder %s583_s16, %s583_s16 }
   0x8   :  { %p590_p3 = por %p589_p2, %p588_p1 }
   0xa   :  { %p591_p4 = pnand %p590_p3, %p584_p0 }
   0xc   :  { %594 = shalt.err (!%p591_p4)
}
   0xd   :  { %22 = dma.hbm_to_vmem [thread:$0]  %s984_s0, 256, %s20_s13, [#allocation3]  }
   0xe   :  { %s603_s19 = scalar_lea.vmem %s30_s15, 256  ;;  %p608_p6 = scmp.lt.s32.totalorder %s30_s15, %s30_s15 }
   0xf   :  { %p604_p5 = scmp.ne.s32.totalorder %s30_s15, %s603_s19  ;;  %p609_p7 = scmp.lt.s32.totalorder %s603_s19, %s603_s19 }
  0x11   :  { %p610_p8 = por %p609_p7, %p608_p6 }
  0x13   :  { %p611_p9 = pnand %p610_p8, %p604_p5 }
  0x15   :  { %614 = shalt.err (!%p611_p9)
}
  0x16   :  { %32 = dma.hbm_to_vmem [thread:$0]  %s985_s1, 256, %s30_s15, [#allocation6]  }
  0x17   :  { %655 = dma.done.wait [#allocation3], 256  }
  0x18   :  { %656 = vsyncadd [#allocation3], 4294967040 }
  0x19   :  { %657 = dma.done.wait [#allocation6], 256  }
  0x1a   :  { %658 = vsyncadd [#allocation6], 4294967040  ;;  %v43_v0 = vlaneseq  ;;  %v665_v1 = vmov 1966171168   ;;  %v41_v29 = vld [vmem:[#allocation5] sm:$0xff]  ;;  %v39_v31 = vld [vmem:[#allocation2] sm:$0xff] }
  0x1b   :  { %v694_v2 = vunpack.c.l.s4 %v665_v1  ;;  %s666_s0 = smov [#allocation7]  }
  0x1c   :  { %v696_v3 = vand.u32 127, %v43_v0  ;;  %v698_v4 = vshrl.u32 %v43_v0, 7  ;;  %s546_s1 = sshll.u32 %s666_s0, 4  ;;  %s547_s1 = int_to_ptr.vmem [resolvable:$true] %s546_s1 }
  0x1d   :  { %v310_v5 = vunpack.c.0.s8 %v694_v2  ;;  %s615_s22 = scalar_lea.vmem %s547_s1, 256  ;;  %p620_p11 = scmp.lt.s32.totalorder %s547_s1, %s547_s1 }
  0x1e   :  { %v45_v6 = vadd.s32 128, %v696_v3  ;;  %v46_v7 = vadd.s32 256, %v696_v3  ;;  %v47_v8 = vadd.s32 384, %v696_v3  ;;  %v48_v9 = vadd.s32 512, %v696_v3  ;;  %p616_p10 = scmp.ne.s32.totalorder %s547_s1, %s615_s22  ;;  %p621_p12 = scmp.lt.s32.totalorder %s615_s22, %s615_s22 }
  0x1f   :  { %v49_v10 = vadd.s32 640, %v696_v3  ;;  %v50_v11 = vadd.s32 768, %v696_v3  ;;  %v51_v12 = vadd.s32 896, %v696_v3  ;;  %v60_v13 = vand.u32 15, %v696_v3 }
  0x20   :  { %v61_v14 = vand.u32 15, %v45_v6  ;;  %v62_v15 = vand.u32 15, %v46_v7  ;;  %v63_v16 = vand.u32 15, %v47_v8  ;;  %v64_v17 = vand.u32 15, %v48_v9  ;;  %p622_p13 = por %p621_p12, %p620_p11 }
  0x21   :  { %v65_v18 = vand.u32 15, %v49_v10  ;;  %v66_v19 = vand.u32 15, %v50_v11  ;;  %v67_v20 = vand.u32 15, %v51_v12  ;;  %v709_v21 = vand.u32 1, %v60_v13 }
  0x22   :  { %v711_v22 = vand.u32 1, %v61_v14  ;;  %v713_v23 = vand.u32 1, %v62_v15  ;;  %v715_v24 = vand.u32 1, %v63_v16  ;;  %v717_v25 = vand.u32 1, %v64_v17  ;;  %p623_p0 = pnand %p622_p13, %p616_p10 }
  0x23   :  { %v719_v26 = vand.u32 1, %v65_v18  ;;  %v721_v27 = vand.u32 1, %v66_v19  ;;  %v723_v28 = vand.u32 1, %v67_v20  ;;  %vm92_vm0 = vcmp.eq.s32.totalorder %v709_v21, 0 }
  0x24   :  { %vm93_vm1 = vcmp.eq.s32.totalorder %v711_v22, 0  ;;  %vm94_vm2 = vcmp.eq.s32.totalorder %v713_v23, 0  ;;  %vm95_vm3 = vcmp.eq.s32.totalorder %v715_v24, 0  ;;  %vm96_vm4 = vcmp.eq.s32.totalorder %v717_v25, 0 }
  0x25   :  { %vm97_vm5 = vcmp.eq.s32.totalorder %v719_v26, 0  ;;  %vm98_vm6 = vcmp.eq.s32.totalorder %v721_v27, 0  ;;  %vm99_vm7 = vcmp.eq.s32.totalorder %v723_v28, 0  ;;  %v734_v30 = vsub.s32 0, %v698_v4 }
  0x26   :  { %v737_v32 = vsub.s32 1, %v698_v4  ;;  %v740_v33 = vsub.s32 2, %v698_v4  ;;  %v743_v34 = vsub.s32 3, %v698_v4  ;;  %v746_v35 = vsub.s32 4, %v698_v4 }
  0x27   :  { %v749_v36 = vrot.slane %v41_v29, %v734_v30  ;;  %v752_v37 = vsub.s32 5, %v698_v4  ;;  %v755_v38 = vsub.s32 6, %v698_v4  ;;  %v758_v39 = vsub.s32 7, %v698_v4 }
  0x28   :  { %v761_v40 = vrot.slane %v41_v29, %v737_v32  ;;  %v764_v41 = vrot.slane %v41_v29, %v740_v33  ;;  %v767_v42 = vrot.slane %v41_v29, %v743_v34  ;;  %v770_v43 = vrot.slane %v41_v29, %v746_v35 }
  0x29   :  { %v773_v44 = vrot.slane %v41_v29, %v752_v37  ;;  %v776_v45 = vrot.slane %v41_v29, %v755_v38  ;;  %v779_v46 = vrot.slane %v41_v29, %v758_v39  ;;  %v782_v47 = vrot.slane %v39_v31, %v734_v30 }
  0x2a   :  { %v785_v48 = vrot.slane %v39_v31, %v737_v32  ;;  %v788_v49 = vrot.slane %v39_v31, %v740_v33  ;;  %v791_v50 = vrot.slane %v39_v31, %v743_v34  ;;  %v794_v51 = vrot.slane %v39_v31, %v746_v35 }
  0x2b   :  { %v797_v52 = vrot.slane %v39_v31, %v752_v37  ;;  %v800_v53 = vrot.slane %v39_v31, %v755_v38  ;;  %v803_v54 = vrot.slane %v39_v31, %v758_v39  ;;  %v272_v55 = vsel %vm92_vm0, %v749_v36, %v782_v47 }
  0x2c   :  { %v273_v56 = vsel %vm93_vm1, %v761_v40, %v785_v48  ;;  %v274_v57 = vsel %vm94_vm2, %v764_v41, %v788_v49  ;;  %v275_v58 = vsel %vm95_vm3, %v767_v42, %v791_v50  ;;  %v276_v59 = vsel %vm96_vm4, %v770_v43, %v794_v51 }
  0x2d   :  { %v277_v60 = vsel %vm97_vm5, %v773_v44, %v797_v52  ;;  %v278_v61 = vsel %vm98_vm6, %v776_v45, %v800_v53  ;;  %v279_v62 = vsel %vm99_vm7, %v779_v46, %v803_v54  ;;  %v304_v63 = vcombine.low %v272_v55, %v273_v56 }
  0x2e   :  { %v305_v0 = vcombine.low %v274_v57, %v275_v58  ;;  %v306_v1 = vcombine.low %v276_v59, %v277_v60  ;;  %v307_v6 = vcombine.low %v278_v61, %v279_v62  ;;  %v840_v7 = vsub.s32 %v310_v5, %v698_v4 }
  0x2f   :  { %v52_v8 = vadd.s32 1024, %v696_v3  ;;  %v53_v9 = vadd.s32 1152, %v696_v3  ;;  %v54_v10 = vadd.s32 1280, %v696_v3  ;;  %v55_v11 = vadd.s32 1408, %v696_v3 }
  0x30   :  { %v314_v12 = vrot.slane %v304_v63, %v840_v7  ;;  %v321_v13 = vrot.slane %v305_v0, %v840_v7  ;;  %v328_v14 = vrot.slane %v306_v1, %v840_v7  ;;  %v335_v15 = vrot.slane %v307_v6, %v840_v7  ;;  %v42_v1 = vld [vmem:[#allocation5 + $0x8] sm:$0xff] }
  0x31   :  { %v56_v2 = vadd.s32 1536, %v696_v3  ;;  %v57_v4 = vadd.s32 1664, %v696_v3  ;;  %v58_v5 = vadd.s32 1792, %v696_v3  ;;  %v59_v16 = vadd.s32 1920, %v696_v3 }
  0x32   :  { %v336_v17 = vcombine.low %v314_v12, %v321_v13  ;;  %v337_v18 = vcombine.low %v328_v14, %v335_v15  ;;  %v68_v19 = vand.u32 15, %v52_v8  ;;  %v69_v20 = vand.u32 15, %v53_v9 }
  0x33   :  { %v70_v29 = vand.u32 15, %v54_v10  ;;  %v71_v31 = vand.u32 15, %v55_v11  ;;  %v72_v55 = vand.u32 15, %v56_v2  ;;  %v73_v56 = vand.u32 15, %v57_v4  ;;  %v40_v11 = vld [vmem:[#allocation2 + $0x8] sm:$0xff] }
  0x34   :  { %v344_v57 = vrot.slane %v336_v17, %v840_v7  ;;  %v351_v58 = vrot.slane %v337_v18, %v840_v7  ;;  %v74_v59 = vand.u32 15, %v58_v5  ;;  %v75_v60 = vand.u32 15, %v59_v16 }
  0x35   :  { %v856_v61 = vand.u32 1, %v68_v19  ;;  %v858_v62 = vand.u32 1, %v69_v20  ;;  %v860_v63 = vand.u32 1, %v70_v29  ;;  %v862_v3 = vand.u32 1, %v71_v31 }
  0x36   :  { %v352_v0 = vcombine.low %v344_v57, %v351_v58  ;;  %v864_v6 = vand.u32 1, %v72_v55  ;;  %v866_v8 = vand.u32 1, %v73_v56  ;;  %v868_v9 = vand.u32 1, %v74_v59 }
  0x37   :  { %v870_v10 = vand.u32 1, %v75_v60  ;;  %vm100_vm8 = vcmp.eq.s32.totalorder %v856_v61, 0  ;;  %vm101_vm9 = vcmp.eq.s32.totalorder %v858_v62, 0  ;;  %vm102_vm10 = vcmp.eq.s32.totalorder %v860_v63, 0 }
  0x38   :  { %404 = vst [vmem:[#allocation7] sm:$0xff] %v352_v0  ;;  %vm103_vm11 = vcmp.eq.s32.totalorder %v862_v3, 0  ;;  %vm104_vm12 = vcmp.eq.s32.totalorder %v864_v6, 0  ;;  %vm105_vm13 = vcmp.eq.s32.totalorder %v866_v8, 0  ;;  %vm106_vm14 = vcmp.eq.s32.totalorder %v868_v9, 0 }
  0x39   :  { %vm107_vm15 = vcmp.eq.s32.totalorder %v870_v10, 0  ;;  %v145_v12 = vrot.slane %v42_v1, %v734_v30  ;;  %v149_v13 = vrot.slane %v42_v1, %v737_v32  ;;  %v153_v14 = vrot.slane %v42_v1, %v740_v33 }
  0x3a   :  { %v157_v15 = vrot.slane %v42_v1, %v743_v34  ;;  %v161_v2 = vrot.slane %v42_v1, %v746_v35  ;;  %v165_v4 = vrot.slane %v42_v1, %v752_v37  ;;  %v169_v5 = vrot.slane %v42_v1, %v755_v38 }
  0x3b   :  { %v173_v16 = vrot.slane %v42_v1, %v758_v39  ;;  %v227_v17 = vrot.slane %v40_v11, %v734_v30  ;;  %v231_v18 = vrot.slane %v40_v11, %v737_v32  ;;  %v235_v19 = vrot.slane %v40_v11, %v740_v33 }
  0x3c   :  { %v239_v20 = vrot.slane %v40_v11, %v743_v34  ;;  %v243_v29 = vrot.slane %v40_v11, %v746_v35  ;;  %v247_v31 = vrot.slane %v40_v11, %v752_v37  ;;  %v251_v55 = vrot.slane %v40_v11, %v755_v38 }
  0x3d   :  { %v255_v56 = vrot.slane %v40_v11, %v758_v39  ;;  %v280_v57 = vsel %vm100_vm8, %v145_v12, %v227_v17  ;;  %v281_v30 = vsel %vm101_vm9, %v149_v13, %v231_v18  ;;  %v282_v32 = vsel %vm102_vm10, %v153_v14, %v235_v19 }
  0x3e   :  { %v283_v33 = vsel %vm103_vm11, %v157_v15, %v239_v20  ;;  %v284_v34 = vsel %vm104_vm12, %v161_v2, %v243_v29  ;;  %v285_v35 = vsel %vm105_vm13, %v165_v4, %v247_v31  ;;  %v286_v37 = vsel %vm106_vm14, %v169_v5, %v251_v55 }
  0x3f   :  { %v287_v38 = vsel %vm107_vm15, %v173_v16, %v255_v56  ;;  %v353_v39 = vcombine.low %v280_v57, %v281_v30  ;;  %v354_v58 = vcombine.low %v282_v32, %v283_v33  ;;  %v355_v59 = vcombine.low %v284_v34, %v285_v35 }
  0x40   :  { %v356_v60 = vcombine.low %v286_v37, %v287_v38  ;;  %v406_v0 = vsel %vm92_vm0, %v782_v47, %v749_v36  ;;  %v407_v1 = vsel %vm93_vm1, %v785_v48, %v761_v40  ;;  %v408_v11 = vsel %vm94_vm2, %v788_v49, %v764_v41 }
  0x41   :  { %v363_v57 = vrot.slane %v353_v39, %v840_v7  ;;  %v370_v30 = vrot.slane %v354_v58, %v840_v7  ;;  %v377_v32 = vrot.slane %v355_v59, %v840_v7  ;;  %v409_v21 = vsel %vm95_vm3, %v791_v50, %v767_v42 }
  0x42   :  { %v384_v36 = vrot.slane %v356_v60, %v840_v7  ;;  %v410_v22 = vsel %vm96_vm4, %v794_v51, %v770_v43  ;;  %v411_v23 = vsel %vm97_vm5, %v797_v52, %v773_v44  ;;  %v412_v40 = vsel %vm98_vm6, %v800_v53, %v776_v45 }
  0x43   :  { %v385_v41 = vcombine.low %v363_v57, %v370_v30  ;;  %v413_v24 = vsel %vm99_vm7, %v803_v54, %v779_v46  ;;  %v438_v42 = vcombine.low %v406_v0, %v407_v1  ;;  %v439_v47 = vcombine.low %v408_v11, %v409_v21 }
  0x44   :  { %v386_v25 = vcombine.low %v377_v32, %v384_v36  ;;  %v440_v43 = vcombine.low %v410_v22, %v411_v23  ;;  %v441_v48 = vcombine.low %v412_v40, %v413_v24  ;;  %v414_v26 = vsel %vm100_vm8, %v227_v17, %v145_v12 }
  0x45   :  { %v393_v44 = vrot.slane %v385_v41, %v840_v7  ;;  %v448_v49 = vrot.slane %v438_v42, %v840_v7  ;;  %v455_v27 = vrot.slane %v439_v47, %v840_v7  ;;  %v415_v45 = vsel %vm101_vm9, %v231_v18, %v149_v13 }
  0x46   :  { %v400_v28 = vrot.slane %v386_v25, %v840_v7  ;;  %v462_v46 = vrot.slane %v440_v43, %v840_v7  ;;  %v469_v50 = vrot.slane %v441_v48, %v840_v7  ;;  %v416_v51 = vsel %vm102_vm10, %v235_v19, %v153_v14 }
  0x47   :  { %v470_v52 = vcombine.low %v448_v49, %v455_v27  ;;  %v417_v53 = vsel %vm103_vm11, %v239_v20, %v157_v15  ;;  %v418_v54 = vsel %vm104_vm12, %v243_v29, %v161_v2  ;;  %v419_v61 = vsel %vm105_vm13, %v247_v31, %v165_v4 }
  0x48   :  { %v401_v62 = vcombine.low %v393_v44, %v400_v28  ;;  %v471_v12 = vcombine.low %v462_v46, %v469_v50  ;;  %v420_v13 = vsel %vm106_vm14, %v251_v55, %v169_v5  ;;  %v421_v17 = vsel %vm107_vm15, %v255_v56, %v173_v16 }
  0x49   :  { %v478_v63 = vrot.slane %v470_v52, %v840_v7  ;;  %v487_v14 = vcombine.low %v414_v26, %v415_v45  ;;  %v488_v3 = vcombine.low %v416_v51, %v417_v53  ;;  %v489_v15 = vcombine.low %v418_v54, %v419_v61 }
  0x4a   :  { %405 = vst [vmem:[#allocation7 + $0x8] sm:$0xff] %v401_v62  ;;  %v485_v6 = vrot.slane %v471_v12, %v840_v7  ;;  %v490_v2 = vcombine.low %v420_v13, %v421_v17 }
  0x4b   :  { %v497_v8 = vrot.slane %v487_v14, %v840_v7  ;;  %v504_v4 = vrot.slane %v488_v3, %v840_v7  ;;  %v511_v9 = vrot.slane %v489_v15, %v840_v7 }
  0x4c   :  { %626 = shalt.err (!%p623_p0)
}
  0x4d   :  { %549 = dma.vmem_to_hbm [thread:$0]  %s547_s1, 256, %s986_s2, [#allocation4]   ;;  %v486_v10 = vcombine.low %v478_v63, %v485_v6  ;;  %v518_v5 = vrot.slane %v490_v2, %v840_v7  ;;  %v519_v16 = vcombine.low %v497_v8, %v504_v4 }
  0x4e   :  { %s667_s25 = smov [#allocation8]  }
  0x4f   :  { %538 = vst [vmem:[#allocation8] sm:$0xff] %v486_v10  ;;  %v520_v18 = vcombine.low %v511_v9, %v518_v5  ;;  %v527_v19 = vrot.slane %v519_v16, %v840_v7  ;;  %s556_s26 = sshll.u32 %s667_s25, 4  ;;  %s557_s26 = int_to_ptr.vmem [resolvable:$true] %s556_s26 }
  0x50   :  { %s635_s27 = scalar_lea.vmem %s557_s26, 256  ;;  %p640_p2 = scmp.lt.s32.totalorder %s557_s26, %s557_s26 }
  0x51   :  { %v534_v20 = vrot.slane %v520_v18, %v840_v7  ;;  %p636_p1 = scmp.ne.s32.totalorder %s557_s26, %s635_s27  ;;  %p641_p3 = scmp.lt.s32.totalorder %s635_s27, %s635_s27 }
  0x53   :  { %v535_v29 = vcombine.low %v527_v19, %v534_v20  ;;  %p642_p4 = por %p641_p3, %p640_p2 }
  0x55   :  { %539 = vst [vmem:[#allocation8 + $0x8] sm:$0xff] %v535_v29  ;;  %p643_p5 = pnand %p642_p4, %p636_p1 }
  0x57   :  { %646 = shalt.err (!%p643_p5)
}
  0x58   :  { %559 = dma.vmem_to_hbm [thread:$0]  %s557_s26, 256, %s987_s3, [#allocation9]  }
  0x59   :  { %659 = dma.done.wait [#allocation4], 256  }
  0x5a   :  { %660 = vsyncadd [#allocation4], 4294967040 }
  0x5b   :  { %661 = dma.done.wait [#allocation9], 256  }
  0x5c   :  { %662 = vsyncadd [#allocation9], 4294967040 }
  0x5d   :  { %566 = vsyncpa [#allocation3], 1 }
  0x5e   :  { %567 = vsyncpa [#allocation6], 1 }
  0x5f   :  { %568 = vsyncpa [#allocation4], 1 }
  0x60   :  { %569 = vsyncpa [#allocation9], 1 }

</bundles_post_ra>
